<compile_context>
chip_gen: v5e
topology: v5e:2x2
jax: 0.10.0
libtpu: 0.0.40
codegen_flags: <defaults>
</compile_context>

<pallas_src>
import jax
import jax.numpy as jnp
from jax.experimental import pallas as pl
from jax.experimental.pallas import tpu as pltpu

INPUT_DIM = 22 * 10 + 1 + 1   # 222, as in the reference script
OUTPUT_DIM = 5                # ALE/Tetris-v5 action space size
HIDDEN = (512, 256, 128, 64)

# ---- padded (lane-aligned) dimensions ------------------------------------------------
IN_PAD = 256                  # 222 -> 256 (zero-padded input features / w1 rows)
D1, D2, D3 = 512, 256, 128
D4P = 128                     # 64  -> 128 (zero-padded cols of w4 / rows of w5)
D5P = 128                     # 5   -> 128 (zero-padded output lanes)
SLAB_W = 512                  # slab lane width = max layer width

# ---- dense parameter-slab layout ------------------------------------------------------
# rows 0:256   cols 0:512    w1 [256, 512]      (222x512 real)
# rows 256:768 cols 0:256    w2 [512, 256]
# rows 256:512 cols 256:384  w3 [256, 128]
# rows 512:640 cols 256:384  w4 [128, 128]      (128x64 real)
# rows 640:768 cols 256:384  w5 [128, 128]      (64x5 real)
# rows 768:773 cols 0:*      b1..b5 (one row each, inside one 16-row-aligned block)
W1_ROW = 0
W2_ROW = 256
W3_ROW = 256
W4_ROW = 512
W5_ROW = 640
NARROW_COL = 256              # lane offset of the w3/w4/w5 band (multiple of 128)
BIAS_ROW = 768                # 16-row aligned
TOTAL_ROWS = 784              # multiple of 16 -> ~0.77 MB bf16 slab


def qnetwork_kernel(x_ref, p_ref, out_ref):
    """One batch tile: 4x (bf16 matmul -> f32 bias+ReLU) + final matmul + bias.

    x_ref:  [TB, IN_PAD]        bf16  (zero-padded activations)
    p_ref:  [TOTAL_ROWS, 512]   bf16  dense parameter slab (resident, Buffered(1))
    out_ref:[TB, D5P]           f32   (lane-padded; real logits are cols 0..4)
    """
    f32 = jnp.float32
    bf16 = jnp.bfloat16

    # Weight / bias views (single load each, reused by both sub-tiles).
    w1 = p_ref[W1_ROW:W1_ROW + IN_PAD, :D1]
    w2 = p_ref[W2_ROW:W2_ROW + D1, :D2]
    w3 = p_ref[W3_ROW:W3_ROW + D2, NARROW_COL:NARROW_COL + D3]
    w4 = p_ref[W4_ROW:W4_ROW + D3, NARROW_COL:NARROW_COL + D4P]
    w5 = p_ref[W5_ROW:W5_ROW + D4P, NARROW_COL:NARROW_COL + D5P]
    b1 = p_ref[BIAS_ROW + 0:BIAS_ROW + 1, :D1].astype(f32)
    b2 = p_ref[BIAS_ROW + 1:BIAS_ROW + 2, :D2].astype(f32)
    b3 = p_ref[BIAS_ROW + 2:BIAS_ROW + 3, :D3].astype(f32)
    b4 = p_ref[BIAS_ROW + 3:BIAS_ROW + 4, :D4P].astype(f32)
    b5 = p_ref[BIAS_ROW + 4:BIAS_ROW + 5, :D5P].astype(f32)

    def mlp(x):
        h = jnp.maximum(jnp.dot(x, w1, preferred_element_type=f32) + b1, 0.0).astype(bf16)
        h = jnp.maximum(jnp.dot(h, w2, preferred_element_type=f32) + b2, 0.0).astype(bf16)
        h = jnp.maximum(jnp.dot(h, w3, preferred_element_type=f32) + b3, 0.0).astype(bf16)
        h = jnp.maximum(jnp.dot(h, w4, preferred_element_type=f32) + b4, 0.0).astype(bf16)
        return jnp.dot(h, w5, preferred_element_type=f32) + b5

    tb = x_ref.shape[0]
    if tb >= 256:
        # Two independent row sub-tiles: the LLO scheduler interleaves sub-tile B's
        # matmuls with sub-tile A's VPU epilogue, hiding inter-layer MXU drain.
        half = tb // 2                                    # multiple of 128
        out_ref[:half, :] = mlp(x_ref[:half, :]).astype(out_ref.dtype)
        out_ref[half:, :] = mlp(x_ref[half:, :]).astype(out_ref.dtype)
    else:
        out_ref[...] = mlp(x_ref[...]).astype(out_ref.dtype)


def _round_up(n, m):
    return (n + m - 1) // m * m


def _pad2(a, rows, cols):
    return jnp.zeros((rows, cols), a.dtype).at[: a.shape[0], : a.shape[1]].set(a)


def pack_params(params):
    """Pack [(W [in,out] f32, b [out] f32)] x 5 into one dense bf16 slab [784, 512]."""
    (w1, b1), (w2, b2), (w3, b3), (w4, b4), (w5, b5) = params
    slab = jnp.zeros((TOTAL_ROWS, SLAB_W), jnp.float32)
    slab = slab.at[W1_ROW:W1_ROW + IN_PAD, :D1].set(_pad2(w1, IN_PAD, D1))
    slab = slab.at[W2_ROW:W2_ROW + D1, :D2].set(_pad2(w2, D1, D2))
    slab = slab.at[W3_ROW:W3_ROW + D2, NARROW_COL:NARROW_COL + D3].set(_pad2(w3, D2, D3))
    slab = slab.at[W4_ROW:W4_ROW + D3, NARROW_COL:NARROW_COL + D4P].set(_pad2(w4, D3, D4P))
    slab = slab.at[W5_ROW:W5_ROW + D4P, NARROW_COL:NARROW_COL + D5P].set(_pad2(w5, D4P, D5P))
    slab = slab.at[BIAS_ROW + 0, :b1.shape[0]].set(b1)
    slab = slab.at[BIAS_ROW + 1, :b2.shape[0]].set(b2)
    slab = slab.at[BIAS_ROW + 2, :b3.shape[0]].set(b3)
    slab = slab.at[BIAS_ROW + 3, :b4.shape[0]].set(b4)
    slab = slab.at[BIAS_ROW + 4, :b5.shape[0]].set(b5)
    return slab.astype(jnp.bfloat16)


def _choose_tb(batch):
    """Batch tile: multiple of 16 for small B; multiple of 256 (<=1024, >=2 grid steps)
    for large B so the 256-wide MXU is filled and both v7x TensorCores get work."""
    if batch <= 256:
        return _round_up(max(batch, 1), 16)
    b256 = _round_up(batch, 256)
    return min(1024, max(256, (b256 // 2) // 256 * 256))


@jax.jit
def qnetwork_forward(x, slab):
    """x: [B, INPUT_DIM] f32; slab: [TOTAL_ROWS, 512] bf16. Returns [B, OUTPUT_DIM] f32."""
    B = x.shape[0]
    TB = _choose_tb(B)
    B_pad = _round_up(B, TB)

    xp = jnp.zeros((B_pad, IN_PAD), jnp.bfloat16)
    xp = xp.at[:B, :INPUT_DIM].set(x.astype(jnp.bfloat16))

    flops = 2 * B_pad * (IN_PAD * D1 + D1 * D2 + D2 * D3 + D3 * D4P + D4P * D5P)
    bytes_accessed = xp.size * 2 + TOTAL_ROWS * SLAB_W * 2 + B_pad * D5P * 4
    cost = pl.CostEstimate(flops=flops, transcendentals=0, bytes_accessed=bytes_accessed)

    out = pl.pallas_call(
        qnetwork_kernel,
        out_shape=jax.ShapeDtypeStruct((B_pad, D5P), jnp.float32),
        grid=(B_pad // TB,),
        in_specs=[
            # activations: one tile per grid step
            pl.BlockSpec((TB, IN_PAD), lambda i: (i, 0)),
            # weights: resident (constant index_map) -> single buffer is enough
            pl.BlockSpec((TOTAL_ROWS, SLAB_W), lambda i: (0, 0),
                         pipeline_mode=pl.Buffered(1)),
        ],
        out_specs=pl.BlockSpec((TB, D5P), lambda i: (i, 0)),
        compiler_params=pltpu.CompilerParams(
            dimension_semantics=("parallel",),
            vmem_limit_bytes=32 << 20,
        ),
        cost_estimate=cost,
    )(xp, slab)
    return out[:B, :OUTPUT_DIM]


def init_params(key):
    """Deterministic init mimicking nn.Linear default: U(-1/sqrt(fan_in), 1/sqrt(fan_in)).

    Weights stored [in, out] (transposed vs. PyTorch) so the kernel computes x @ W + b.
    """
    dims = (INPUT_DIM,) + HIDDEN + (OUTPUT_DIM,)
    params = []
    for i in range(len(dims) - 1):
        fan_in, fan_out = dims[i], dims[i + 1]
        key, kw, kb = jax.random.split(key, 3)
        bound = 1.0 / jnp.sqrt(fan_in)
        w = jax.random.uniform(kw, (fan_in, fan_out), jnp.float32, -bound, bound)
        b = jax.random.uniform(kb, (fan_out,), jnp.float32, -bound, bound)
        params.append((w, b))
    return params


def reference_forward(x, params):
    """Pure-JAX reference matching the kernel's numerics (bf16 weights/activations,
    f32 accumulation and bias/ReLU)."""
    # TODO(synk): the PyTorch module runs fully in f32; bf16 weight/activation drift
    # vs. the true f32 model should be validated separately before use in training.
    f32, bf16 = jnp.float32, jnp.bfloat16
    h = x.astype(bf16)
    n = len(params)
    out = None
    for idx, (w, b) in enumerate(params):
        y = jnp.dot(h, w.astype(bf16), preferred_element_type=f32)
        y = y + b.astype(bf16).astype(f32)
        if idx < n - 1:
            h = jnp.maximum(y, 0.0).astype(bf16)
        else:
            out = y
    return out


if __name__ == "__main__":
    key = jax.random.PRNGKey(0)
    key, kx1, kx2 = jax.random.split(key, 3)

    params = init_params(key)
    slab = pack_params(params)

    # Small-batch path (TB = 16, single grid step).
    batch = 8
    x = jax.random.normal(kx1, (batch, INPUT_DIM), jnp.float32)
    out = jax.block_until_ready(qnetwork_forward(x, slab))
    ref = reference_forward(x, params)
    assert out.shape == (batch, OUTPUT_DIM), out.shape
    assert jnp.allclose(out, ref, atol=1e-2, rtol=1e-2), float(jnp.max(jnp.abs(out - ref)))

    # Larger-batch path (TB = 256, multi-step grid, in-kernel 2-way sub-tiling).
    batch2 = 300
    x2 = jax.random.normal(kx2, (batch2, INPUT_DIM), jnp.float32)
    out2 = jax.block_until_ready(qnetwork_forward(x2, slab))
    ref2 = reference_forward(x2, params)
    assert out2.shape == (batch2, OUTPUT_DIM), out2.shape
    assert jnp.allclose(out2, ref2, atol=1e-2, rtol=1e-2), float(jnp.max(jnp.abs(out2 - ref2)))

    print("KERNEL_OK")
</pallas_src>

<mosaic_0001>
module attributes {stable_mosaic.version = 11 : i64} {
  func.func @qnetwork_kernel(%arg0: i32, %arg1: memref<16x256xbf16, #tpu.memory_space<vmem>>, %arg2: memref<784x512xbf16, #tpu.memory_space<vmem>>, %arg3: memref<16x128xf32, #tpu.memory_space<vmem>>) attributes {dimension_semantics = [#tpu.dimension_semantics<parallel>], iteration_bounds = array<i64: 1>, scalar_prefetch = 0 : i64, scratch_operands = 0 : i64, tpu.core_type = #tpu.core_type<tc>, window_params = [{transform_indices = @transform_0, window_bounds = array<i64: 16, 256>}, {pipeline_mode = #tpu.pipeline_mode<synchronous>, transform_indices = @transform_1, window_bounds = array<i64: 784, 512>}, {transform_indices = @transform_2, window_bounds = array<i64: 16, 128>}]} {
    %c0 = arith.constant 0 : index
    %c0_0 = arith.constant 0 : index
    %0 = vector.load %arg2[%c0, %c0_0] : memref<784x512xbf16, #tpu.memory_space<vmem>>, vector<256x512xbf16>
    %c256 = arith.constant 256 : index
    %c0_1 = arith.constant 0 : index
    %1 = vector.load %arg2[%c256, %c0_1] : memref<784x512xbf16, #tpu.memory_space<vmem>>, vector<512x256xbf16>
    %c256_2 = arith.constant 256 : index
    %c256_3 = arith.constant 256 : index
    %2 = vector.load %arg2[%c256_2, %c256_3] : memref<784x512xbf16, #tpu.memory_space<vmem>>, vector<256x128xbf16>
    %c512 = arith.constant 512 : index
    %c256_4 = arith.constant 256 : index
    %3 = vector.load %arg2[%c512, %c256_4] : memref<784x512xbf16, #tpu.memory_space<vmem>>, vector<128x128xbf16>
    %c640 = arith.constant 640 : index
    %c256_5 = arith.constant 256 : index
    %4 = vector.load %arg2[%c640, %c256_5] : memref<784x512xbf16, #tpu.memory_space<vmem>>, vector<128x128xbf16>
    %c768 = arith.constant 768 : index
    %c0_6 = arith.constant 0 : index
    %5 = vector.load %arg2[%c768, %c0_6] : memref<784x512xbf16, #tpu.memory_space<vmem>>, vector<1x512xbf16>
    %6 = arith.extf %5 : vector<1x512xbf16> to vector<1x512xf32>
    %c769 = arith.constant 769 : index
    %c0_7 = arith.constant 0 : index
    %7 = vector.load %arg2[%c769, %c0_7] : memref<784x512xbf16, #tpu.memory_space<vmem>>, vector<1x256xbf16>
    %8 = arith.extf %7 : vector<1x256xbf16> to vector<1x256xf32>
    %c770 = arith.constant 770 : index
    %c0_8 = arith.constant 0 : index
    %9 = vector.load %arg2[%c770, %c0_8] : memref<784x512xbf16, #tpu.memory_space<vmem>>, vector<1x128xbf16>
    %10 = arith.extf %9 : vector<1x128xbf16> to vector<1x128xf32>
    %c771 = arith.constant 771 : index
    %c0_9 = arith.constant 0 : index
    %11 = vector.load %arg2[%c771, %c0_9] : memref<784x512xbf16, #tpu.memory_space<vmem>>, vector<1x128xbf16>
    %12 = arith.extf %11 : vector<1x128xbf16> to vector<1x128xf32>
    %c772 = arith.constant 772 : index
    %c0_10 = arith.constant 0 : index
    %13 = vector.load %arg2[%c772, %c0_10] : memref<784x512xbf16, #tpu.memory_space<vmem>>, vector<1x128xbf16>
    %14 = arith.extf %13 : vector<1x128xbf16> to vector<1x128xf32>
    %c0_11 = arith.constant 0 : index
    %c0_12 = arith.constant 0 : index
    %15 = vector.load %arg1[%c0_11, %c0_12] : memref<16x256xbf16, #tpu.memory_space<vmem>>, vector<16x256xbf16>
    %cst = arith.constant dense<0.000000e+00> : vector<16x512xf32>
    %16 = tpu.matmul %15, %0, %cst {dimension_numbers = #tpu.dot_dimension_numbers<[1], [0], [0], [1], [0, 0, 1, 1], [], []>} : vector<16x256xbf16>, vector<256x512xbf16>, vector<16x512xf32> -> vector<16x512xf32>
    %17 = vector.broadcast %6 : vector<1x512xf32> to vector<16x512xf32>
    %18 = arith.addf %16, %17 : vector<16x512xf32>
    %cst_13 = arith.constant 0.000000e+00 : f32
    %19 = vector.broadcast %cst_13 : f32 to vector<16x512xf32>
    %20 = arith.maximumf %18, %19 : vector<16x512xf32>
    %21 = arith.truncf %20 : vector<16x512xf32> to vector<16x512xbf16>
    %cst_14 = arith.constant dense<0.000000e+00> : vector<16x256xf32>
    %22 = tpu.matmul %21, %1, %cst_14 {dimension_numbers = #tpu.dot_dimension_numbers<[1], [0], [0], [1], [0, 0, 1, 1], [], []>} : vector<16x512xbf16>, vector<512x256xbf16>, vector<16x256xf32> -> vector<16x256xf32>
    %23 = vector.broadcast %8 : vector<1x256xf32> to vector<16x256xf32>
    %24 = arith.addf %22, %23 : vector<16x256xf32>
    %cst_15 = arith.constant 0.000000e+00 : f32
    %25 = vector.broadcast %cst_15 : f32 to vector<16x256xf32>
    %26 = arith.maximumf %24, %25 : vector<16x256xf32>
    %27 = arith.truncf %26 : vector<16x256xf32> to vector<16x256xbf16>
    %cst_16 = arith.constant dense<0.000000e+00> : vector<16x128xf32>
    %28 = tpu.matmul %27, %2, %cst_16 {dimension_numbers = #tpu.dot_dimension_numbers<[1], [0], [0], [1], [0, 0, 1, 1], [], []>} : vector<16x256xbf16>, vector<256x128xbf16>, vector<16x128xf32> -> vector<16x128xf32>
    %29 = vector.broadcast %10 : vector<1x128xf32> to vector<16x128xf32>
    %30 = arith.addf %28, %29 : vector<16x128xf32>
    %cst_17 = arith.constant 0.000000e+00 : f32
    %31 = vector.broadcast %cst_17 : f32 to vector<16x128xf32>
    %32 = arith.maximumf %30, %31 : vector<16x128xf32>
    %33 = arith.truncf %32 : vector<16x128xf32> to vector<16x128xbf16>
    %cst_18 = arith.constant dense<0.000000e+00> : vector<16x128xf32>
    %34 = tpu.matmul %33, %3, %cst_18 {dimension_numbers = #tpu.dot_dimension_numbers<[1], [0], [0], [1], [0, 0, 1, 1], [], []>} : vector<16x128xbf16>, vector<128x128xbf16>, vector<16x128xf32> -> vector<16x128xf32>
    %35 = vector.broadcast %12 : vector<1x128xf32> to vector<16x128xf32>
    %36 = arith.addf %34, %35 : vector<16x128xf32>
    %cst_19 = arith.constant 0.000000e+00 : f32
    %37 = vector.broadcast %cst_19 : f32 to vector<16x128xf32>
    %38 = arith.maximumf %36, %37 : vector<16x128xf32>
    %39 = arith.truncf %38 : vector<16x128xf32> to vector<16x128xbf16>
    %cst_20 = arith.constant dense<0.000000e+00> : vector<16x128xf32>
    %40 = tpu.matmul %39, %4, %cst_20 {dimension_numbers = #tpu.dot_dimension_numbers<[1], [0], [0], [1], [0, 0, 1, 1], [], []>} : vector<16x128xbf16>, vector<128x128xbf16>, vector<16x128xf32> -> vector<16x128xf32>
    %41 = vector.broadcast %14 : vector<1x128xf32> to vector<16x128xf32>
    %42 = arith.addf %40, %41 : vector<16x128xf32>
    %c0_21 = arith.constant 0 : index
    %c0_22 = arith.constant 0 : index
    %43 = vector.load %arg3[%c0_21, %c0_22] : memref<16x128xf32, #tpu.memory_space<vmem>>, vector<16x128xf32>
    tpu.vector_store %arg3[%c0_21, %c0_22], %42 {strides = array<i32>} : memref<16x128xf32, #tpu.memory_space<vmem>>, vector<16x128xf32>,
    return
  }
  func.func @transform_0(%arg0: i32) -> (i32, i32) {
    %c0_i32 = arith.constant 0 : i32
    %c0_i32_0 = arith.constant 0 : i32
    return %arg0, %c0_i32 : i32, i32
  }
  func.func @transform_1(%arg0: i32) -> (i32, i32) {
    %c0_i32 = arith.constant 0 : i32
    %c0_i32_0 = arith.constant 0 : i32
    %c0_i32_1 = arith.constant 0 : i32
    return %c0_i32, %c0_i32_0 : i32, i32
  }
  func.func @transform_2(%arg0: i32) -> (i32, i32) {
    %c0_i32 = arith.constant 0 : i32
    %c0_i32_0 = arith.constant 0 : i32
    return %arg0, %c0_i32 : i32, i32
  }
}

</mosaic_0001>

<bundles_post_ra>
// kernel: qnetwork_forward.1
= control target key start
LH: loop header
LB: loop body
LE: loop exit
PB: predicated region body
PF: predicated region fallthrough
CT: control target
= control target key end

     0   :  { %7 = vsyncpa [#allocation3], 0  ;;  %s2232_s12 = smov [#allocation2]   ;;  %s2233_s14 = smov 256   ;;  %s2295_s0 = inlined_call_operand.vmem [shape: bf16[16,256], index: 0, kind: input, shape index: {}]   ;;  %s2296_s1 = inlined_call_operand.hbm [shape: bf16[784,512], index: 1, kind: input, shape index: {}]   ;;  %s2297_s2 = inlined_call_operand.vmem [shape: f32[16,128], index: 2, kind: output, shape index: {}]  }
   0x1   :  { %s14_s11 = sshll.u32 %s2296_s1, 4  ;;  %s16_s13 = sshll.u32 %s2232_s12, 4  ;;  %s15_s11 = int_to_ptr.hbm [resolvable:$true] %s14_s11  ;;  %s17_s13 = int_to_ptr.vmem [resolvable:$true] %s16_s13 }
   0x2   :  { %s2234_s15 = smov 16  }
   0x3   :  { %22 = dma.hbm_to_vmem [thread:$0]  %s15_s11, 25088, %s17_s13, [#allocation3], %s2233_s14, %s2233_s14, %s2234_s15  }
   0x4   :  { %2230 = dma.done.wait [#allocation3], 25088  }
   0x5   :  { %2231 = vsyncadd [#allocation3], 4294942208  ;;  %v1515_v0 = vld [vmem:[#allocation2 + $0xe0] sm:$0xf]  ;;  %v2071_v1 = vld [vmem:[#allocation2 + $0xec] sm:$0xf0] }
   0x6   :  { %v1643_v2 = vld [vmem:[#allocation2 + $0x1e0] sm:$0xf]  ;;  %v1516_v3 = vor.u32 %v2071_v1, %v1515_v0  ;;  %v2103_v4 = vld [vmem:[#allocation2 + $0x1ec] sm:$0xf0]  ;;  %v2069_v5 = vld [vmem:[#allocation2 + $0xe4] sm:$0xf] }
   0x7   :  { %v1517_v6 = vld [vmem:[#allocation2 + $0xf0] sm:$0xf0]  ;;  %v1644_v7 = vor.u32 %v2103_v4, %v1643_v2  ;;  %v2101_v9 = vld [vmem:[#allocation2 + $0x1e4] sm:$0xf]  ;;  %v1499_v11 = vld [vmem:[#allocation2 + $0xc0] sm:$0xf] }
   0x8   :  { %v1520_v8 = vor.u32 %v2069_v5, %v1517_v6  ;;  %v1645_v10 = vld [vmem:[#allocation2 + $0x1f0] sm:$0xf0]  ;;  %565 = vmatpush.bf16.msra.mxu0 %v1516_v3  ;;  %v2067_v13 = vld [vmem:[#allocation2 + $0xcc] sm:$0xf0]  ;;  %v1627_v14 = vld [vmem:[#allocation2 + $0x1c0] sm:$0xf] }
   0x9   :  { %v1648_v12 = vor.u32 %v2101_v9, %v1645_v10  ;;  %v2099_v15 = vld [vmem:[#allocation2 + $0x1cc] sm:$0xf0]  ;;  %579 = vmatpush.bf16.msra.mxu1 %v1644_v7  ;;  %v1500_v16 = vor.u32 %v2067_v13, %v1499_v11  ;;  %v2065_v18 = vld [vmem:[#allocation2 + $0xc4] sm:$0xf]  ;;  %v1501_v19 = vld [vmem:[#allocation2 + $0xd0] sm:$0xf0] }
   0xa   :  { %593 = vmatpush.bf16.msra.mxu2 %v1520_v8  ;;  %v1628_v17 = vor.u32 %v2099_v15, %v1627_v14  ;;  %v2097_v20 = vld [vmem:[#allocation2 + $0x1c4] sm:$0xf]  ;;  %v1504_v21 = vor.u32 %v2065_v18, %v1501_v19  ;;  %v1629_v22 = vld [vmem:[#allocation2 + $0x1d0] sm:$0xf0]  ;;  %v1483_v23 = vld [vmem:[#allocation2 + $0xa0] sm:$0xf] }
   0xb   :  { %607 = vmatpush.bf16.msra.mxu3 %v1648_v12  ;;  %v2063_v24 = vld [vmem:[#allocation2 + $0xac] sm:$0xf0]  ;;  %v1632_v25 = vor.u32 %v2097_v20, %v1629_v22  ;;  %v1611_v26 = vld [vmem:[#allocation2 + $0x1a0] sm:$0xf]  ;;  %v2061_v28 = vld [vmem:[#allocation2 + $0xa4] sm:$0xf] }
   0xc   :  { %v2095_v27 = vld [vmem:[#allocation2 + $0x1ac] sm:$0xf0]  ;;  %566 = vmatpush.bf16.msra.mxu0 %v1500_v16  ;;  %v1484_v29 = vor.u32 %v2063_v24, %v1483_v23  ;;  %v1485_v30 = vld [vmem:[#allocation2 + $0xb0] sm:$0xf0]  ;;  %v2093_v31 = vld [vmem:[#allocation2 + $0x1a4] sm:$0xf] }
   0xd   :  { %v1613_v32 = vld [vmem:[#allocation2 + $0x1b0] sm:$0xf0]  ;;  %580 = vmatpush.bf16.msra.mxu1 %v1628_v17  ;;  %v1612_v33 = vor.u32 %v2095_v27, %v1611_v26  ;;  %v1488_v34 = vor.u32 %v2061_v28, %v1485_v30  ;;  %v1467_v35 = vld [vmem:[#allocation2 + $0x80] sm:$0xf]  ;;  %v2059_v36 = vld [vmem:[#allocation2 + $0x8c] sm:$0xf0] }
   0xe   :  { %594 = vmatpush.bf16.msra.mxu2 %v1504_v21  ;;  %v1595_v37 = vld [vmem:[#allocation2 + $0x180] sm:$0xf]  ;;  %v1616_v38 = vor.u32 %v2093_v31, %v1613_v32  ;;  %v2091_v39 = vld [vmem:[#allocation2 + $0x18c] sm:$0xf0]  ;;  %v2057_v40 = vld [vmem:[#allocation2 + $0x84] sm:$0xf]  ;;  %v1468_v44 = vor.u32 %v2059_v36, %v1467_v35 }
   0xf   :  { %608 = vmatpush.bf16.msra.mxu3 %v1632_v25  ;;  %v1469_v41 = vld [vmem:[#allocation2 + $0x90] sm:$0xf0]  ;;  %v2089_v42 = vld [vmem:[#allocation2 + $0x184] sm:$0xf]  ;;  %v1596_v45 = vor.u32 %v2091_v39, %v1595_v37  ;;  %v1451_v47 = vld [vmem:[#allocation2 + $0x60] sm:$0xf] }
  0x10   :  { %v1597_v43 = vld [vmem:[#allocation2 + $0x190] sm:$0xf0]  ;;  %567 = vmatpush.bf16.msra.mxu0 %v1484_v29  ;;  %v1472_v46 = vor.u32 %v2057_v40, %v1469_v41  ;;  %v2055_v48 = vld [vmem:[#allocation2 + $0x6c] sm:$0xf0]  ;;  %v1579_v49 = vld [vmem:[#allocation2 + $0x160] sm:$0xf] }
  0x11   :  { %581 = vmatpush.bf16.msra.mxu1 %v1612_v33  ;;  %v1600_v50 = vor.u32 %v2089_v42, %v1597_v43  ;;  %v2087_v51 = vld [vmem:[#allocation2 + $0x16c] sm:$0xf0]  ;;  %v2053_v52 = vld [vmem:[#allocation2 + $0x64] sm:$0xf]  ;;  %v1453_v53 = vld [vmem:[#allocation2 + $0x70] sm:$0xf0]  ;;  %v1452_v56 = vor.u32 %v2055_v48, %v1451_v47 }
  0x12   :  { %595 = vmatpush.bf16.msra.mxu2 %v1488_v34  ;;  %v2085_v54 = vld [vmem:[#allocation2 + $0x164] sm:$0xf]  ;;  %v1581_v55 = vld [vmem:[#allocation2 + $0x170] sm:$0xf0]  ;;  %v1580_v57 = vor.u32 %v2087_v51, %v1579_v49  ;;  %v1456_v58 = vor.u32 %v2053_v52, %v1453_v53  ;;  %v1435_v59 = vld [vmem:[#allocation2 + $0x40] sm:$0xf] }
  0x13   :  { %609 = vmatpush.bf16.msra.mxu3 %v1616_v38  ;;  %v2051_v60 = vld [vmem:[#allocation2 + $0x4c] sm:$0xf0]  ;;  %v1563_v61 = vld [vmem:[#allocation2 + $0x140] sm:$0xf]  ;;  %v1584_v62 = vor.u32 %v2085_v54, %v1581_v55  ;;  %v2049_v0 = vld [vmem:[#allocation2 + $0x44] sm:$0xf] }
  0x14   :  { %568 = vmatpush.bf16.msra.mxu0 %v1468_v44  ;;  %v2083_v63 = vld [vmem:[#allocation2 + $0x14c] sm:$0xf0]  ;;  %v1437_v1 = vld [vmem:[#allocation2 + $0x50] sm:$0xf0]  ;;  %v2081_v2 = vld [vmem:[#allocation2 + $0x144] sm:$0xf]  ;;  %v1436_v4 = vor.u32 %v2051_v60, %v1435_v59 }
  0x15   :  { %582 = vmatpush.bf16.msra.mxu1 %v1596_v45  ;;  %v1565_v3 = vld [vmem:[#allocation2 + $0x150] sm:$0xf0]  ;;  %v1564_v5 = vor.u32 %v2083_v63, %v1563_v61  ;;  %v1440_v6 = vor.u32 %v2049_v0, %v1437_v1  ;;  %v1419_v7 = vld [vmem:[#allocation2 + $0x20] sm:$0xf]  ;;  %v2047_v8 = vld [vmem:[#allocation2 + $0x2c] sm:$0xf0] }
  0x16   :  { %596 = vmatpush.bf16.msra.mxu2 %v1472_v46  ;;  %v1547_v9 = vld [vmem:[#allocation2 + $0x120] sm:$0xf]  ;;  %v1568_v10 = vor.u32 %v2081_v2, %v1565_v3  ;;  %v2079_v11 = vld [vmem:[#allocation2 + $0x12c] sm:$0xf0]  ;;  %v2045_v12 = vld [vmem:[#allocation2 + $0x24] sm:$0xf]  ;;  %v1420_v16 = vor.u32 %v2047_v8, %v1419_v7 }
  0x17   :  { %610 = vmatpush.bf16.msra.mxu3 %v1600_v50  ;;  %v1421_v13 = vld [vmem:[#allocation2 + $0x30] sm:$0xf0]  ;;  %v2077_v14 = vld [vmem:[#allocation2 + $0x124] sm:$0xf]  ;;  %v1403_v17 = vld [vmem:[#allocation2] sm:$0xf]  ;;  %v1548_v20 = vor.u32 %v2079_v11, %v1547_v9 }
  0x18   :  { %569 = vmatpush.bf16.msra.mxu0 %v1452_v56  ;;  %v1549_v15 = vld [vmem:[#allocation2 + $0x130] sm:$0xf0]  ;;  %v2043_v18 = vld [vmem:[#allocation2 + $0xc] sm:$0xf0]  ;;  %v1531_v19 = vld [vmem:[#allocation2 + $0x100] sm:$0xf]  ;;  %v1424_v21 = vor.u32 %v2045_v12, %v1421_v13 }
  0x19   :  { %583 = vmatpush.bf16.msra.mxu1 %v1580_v57  ;;  %v2075_v22 = vld [vmem:[#allocation2 + $0x10c] sm:$0xf0]  ;;  %v2041_v23 = vld [vmem:[#allocation2 + $0x4] sm:$0xf]  ;;  %v1405_v24 = vld [vmem:[#allocation2 + $0x10] sm:$0xf0]  ;;  %v1552_v25 = vor.u32 %v2077_v14, %v1549_v15  ;;  %v1404_v32 = vor.u32 %v2043_v18, %v1403_v17 }
  0x1a   :  { %597 = vmatpush.bf16.msra.mxu2 %v1456_v58  ;;  %v2073_v26 = vld [vmem:[#allocation2 + $0x104] sm:$0xf]  ;;  %v1533_v27 = vld [vmem:[#allocation2 + $0x110] sm:$0xf0]  ;;  %v1523_v28 = vld [vmem:[#allocation2 + $0xe8] sm:$0xf]  ;;  %v1532_v36 = vor.u32 %v2075_v22, %v1531_v19  ;;  %v1408_v37 = vor.u32 %v2041_v23, %v1405_v24 }
  0x1b   :  { %611 = vmatpush.bf16.msra.mxu3 %v1584_v62  ;;  %v2072_v29 = vld [vmem:[#allocation2 + $0xf4] sm:$0xf0]  ;;  %v1651_v30 = vld [vmem:[#allocation2 + $0x1e8] sm:$0xf]  ;;  %v2070_v33 = vld [vmem:[#allocation2 + $0xec] sm:$0xf]  ;;  %v1536_v41 = vor.u32 %v2073_v26, %v1533_v27 }
  0x1c   :  { %570 = vmatpush.bf16.msra.mxu0 %v1436_v4  ;;  %v2104_v31 = vld [vmem:[#allocation2 + $0x1f4] sm:$0xf0]  ;;  %v1525_v34 = vld [vmem:[#allocation2 + $0xf8] sm:$0xf0]  ;;  %v2102_v35 = vld [vmem:[#allocation2 + $0x1ec] sm:$0xf]  ;;  %v1524_v42 = vor.u32 %v2072_v29, %v1523_v28 }
  0x1d   :  { %584 = vmatpush.bf16.msra.mxu1 %v1564_v5  ;;  %v1653_v38 = vld [vmem:[#allocation2 + $0x1f8] sm:$0xf0]  ;;  %v1395_v39 = vld [vmem:[%s2295_s0] sm:$0xf]  ;;  %v2202_v40 = vld [vmem:[%s2295_s0 + $0x4] sm:$0xf0]  ;;  %v1652_v45 = vor.u32 %v2104_v31, %v1651_v30  ;;  %v1528_v46 = vor.u32 %v2070_v33, %v1525_v34 }
  0x1e   :  { %598 = vmatpush.bf16.msra.mxu2 %v1440_v6  ;;  %v2201_v43 = vld [vmem:[%s2295_s0 + $0x4] sm:$0xf]  ;;  %v1397_v44 = vld [vmem:[%s2295_s0 + $0x8] sm:$0xf0]  ;;  %v1507_v47 = vld [vmem:[#allocation2 + $0xc8] sm:$0xf]  ;;  %v1656_v50 = vor.u32 %v2102_v35, %v1653_v38  ;;  %v2265_v51 = vor.u32 %v2202_v40, %v1395_v39 }
  0x1f   :  { %612 = vmatpush.bf16.msra.mxu3 %v1568_v10  ;;  %v2068_v48 = vld [vmem:[#allocation2 + $0xd4] sm:$0xf0]  ;;  %v1635_v49 = vld [vmem:[#allocation2 + $0x1c8] sm:$0xf]  ;;  %v2066_v53 = vld [vmem:[#allocation2 + $0xcc] sm:$0xf]  ;;  %v2267_v55 = vor.u32 %v2201_v43, %v1397_v44 }
  0x20   :  { %571 = vmatpush.bf16.msra.mxu0 %v1420_v16  ;;  %v2100_v52 = vld [vmem:[#allocation2 + $0x1d4] sm:$0xf0]  ;;  %v1509_v54 = vld [vmem:[#allocation2 + $0xd8] sm:$0xf0]  ;;  %v2098_v56 = vld [vmem:[#allocation2 + $0x1cc] sm:$0xf]  ;;  %v1508_v58 = vor.u32 %v2068_v48, %v1507_v47 }
  0x21   :  { %585 = vmatpush.bf16.msra.mxu1 %v1548_v20  ;;  %v1637_v57 = vld [vmem:[#allocation2 + $0x1d8] sm:$0xf0]  ;;  %v1636_v59 = vor.u32 %v2100_v52, %v1635_v49  ;;  %v1512_v60 = vor.u32 %v2066_v53, %v1509_v54  ;;  %v1491_v61 = vld [vmem:[#allocation2 + $0xa8] sm:$0xf]  ;;  %v2064_v62 = vld [vmem:[#allocation2 + $0xb4] sm:$0xf0] }
  0x22   :  { %599 = vmatpush.bf16.msra.mxu2 %v1424_v21  ;;  %v1619_v63 = vld [vmem:[#allocation2 + $0x1a8] sm:$0xf]  ;;  %v1640_v0 = vor.u32 %v2098_v56, %v1637_v57  ;;  %v2096_v1 = vld [vmem:[#allocation2 + $0x1b4] sm:$0xf0]  ;;  %v2062_v2 = vld [vmem:[#allocation2 + $0xac] sm:$0xf]  ;;  %v1492_v6 = vor.u32 %v2064_v62, %v1491_v61 }
  0x23   :  { %613 = vmatpush.bf16.msra.mxu3 %v1552_v25  ;;  %v1493_v3 = vld [vmem:[#allocation2 + $0xb8] sm:$0xf0]  ;;  %v2094_v4 = vld [vmem:[#allocation2 + $0x1ac] sm:$0xf]  ;;  %v1620_v7 = vor.u32 %v2096_v1, %v1619_v63  ;;  %v1475_v9 = vld [vmem:[#allocation2 + $0x88] sm:$0xf] }
  0x24   :  { %572 = vmatpush.bf16.msra.mxu0 %v1404_v32  ;;  %v1621_v5 = vld [vmem:[#allocation2 + $0x1b8] sm:$0xf0]  ;;  %v1496_v8 = vor.u32 %v2062_v2, %v1493_v3  ;;  %v2060_v10 = vld [vmem:[#allocation2 + $0x94] sm:$0xf0]  ;;  %v1603_v11 = vld [vmem:[#allocation2 + $0x188] sm:$0xf] }
  0x25   :  { %586 = vmatpush.bf16.msra.mxu1 %v1532_v36  ;;  %v1624_v12 = vor.u32 %v2094_v4, %v1621_v5  ;;  %v2092_v13 = vld [vmem:[#allocation2 + $0x194] sm:$0xf0]  ;;  %v2058_v14 = vld [vmem:[#allocation2 + $0x8c] sm:$0xf]  ;;  %v1477_v15 = vld [vmem:[#allocation2 + $0x98] sm:$0xf0]  ;;  %v1476_v18 = vor.u32 %v2060_v10, %v1475_v9 }
  0x26   :  { %600 = vmatpush.bf16.msra.mxu2 %v1408_v37  ;;  %v2090_v16 = vld [vmem:[#allocation2 + $0x18c] sm:$0xf]  ;;  %v1605_v17 = vld [vmem:[#allocation2 + $0x198] sm:$0xf0]  ;;  %v1604_v19 = vor.u32 %v2092_v13, %v1603_v11  ;;  %v1480_v20 = vor.u32 %v2058_v14, %v1477_v15  ;;  %v1459_v21 = vld [vmem:[#allocation2 + $0x68] sm:$0xf] }
  0x27   :  { %614 = vmatpush.bf16.msra.mxu3 %v1536_v41  ;;  %573 = vmatmul.bf16.vlgmr.msra.gmra.mxu0 %v2265_v51  ;;  %v2056_v22 = vld [vmem:[#allocation2 + $0x74] sm:$0xf0]  ;;  %v1587_v23 = vld [vmem:[#allocation2 + $0x168] sm:$0xf]  ;;  %v1608_v24 = vor.u32 %v2090_v16, %v1605_v17  ;;  %v2054_v26 = vld [vmem:[#allocation2 + $0x6c] sm:$0xf] }
  0x28   :  { %621 = vmatpush.bf16.msrb.mxu0 %v1524_v42  ;;  %587 = vmatmul.bf16.vlgmr.msra.gmra.mxu1 %v2267_v55  ;;  %v2088_v25 = vld [vmem:[#allocation2 + $0x174] sm:$0xf0]  ;;  %v1461_v27 = vld [vmem:[#allocation2 + $0x78] sm:$0xf0]  ;;  %v2086_v28 = vld [vmem:[#allocation2 + $0x16c] sm:$0xf]  ;;  %v1460_v30 = vor.u32 %v2056_v22, %v1459_v21 }
  0x29   :  { %635 = vmatpush.bf16.msrb.mxu1 %v1652_v45  ;;  %601 = vmatmul.bf16.vlgmr.msra.gmra.mxu2 %v2265_v51  ;;  %v1589_v29 = vld [vmem:[#allocation2 + $0x178] sm:$0xf0]  ;;  %v1588_v31 = vor.u32 %v2088_v25, %v1587_v23  ;;  %v1464_v32 = vor.u32 %v2054_v26, %v1461_v27  ;;  %v1443_v33 = vld [vmem:[#allocation2 + $0x48] sm:$0xf]  ;;  %v2052_v34 = vld [vmem:[#allocation2 + $0x54] sm:$0xf0] }
  0x2a   :  { %649 = vmatpush.bf16.msrb.mxu2 %v1528_v46  ;;  %615 = vmatmul.bf16.vlgmr.msra.gmra.mxu3 %v2267_v55  ;;  %v1571_v35 = vld [vmem:[#allocation2 + $0x148] sm:$0xf]  ;;  %v1592_v36 = vor.u32 %v2086_v28, %v1589_v29  ;;  %v2084_v37 = vld [vmem:[#allocation2 + $0x154] sm:$0xf0]  ;;  %v2050_v38 = vld [vmem:[#allocation2 + $0x4c] sm:$0xf]  ;;  %v1444_v42 = vor.u32 %v2052_v34, %v1443_v33 }
  0x2b   :  { %663 = vmatpush.bf16.msrb.mxu3 %v1656_v50  ;;  %v1445_v39 = vld [vmem:[#allocation2 + $0x58] sm:$0xf0]  ;;  %v2082_v40 = vld [vmem:[#allocation2 + $0x14c] sm:$0xf]  ;;  %v1572_v43 = vor.u32 %v2084_v37, %v1571_v35  ;;  %v1427_v45 = vld [vmem:[#allocation2 + $0x28] sm:$0xf] }
  0x2c   :  { %622 = vmatpush.bf16.msrb.mxu0 %v1508_v58  ;;  %v1573_v41 = vld [vmem:[#allocation2 + $0x158] sm:$0xf0]  ;;  %v1448_v44 = vor.u32 %v2050_v38, %v1445_v39  ;;  %v2048_v46 = vld [vmem:[#allocation2 + $0x34] sm:$0xf0]  ;;  %v1555_v47 = vld [vmem:[#allocation2 + $0x128] sm:$0xf] }
  0x2d   :  { %636 = vmatpush.bf16.msrb.mxu1 %v1636_v59  ;;  %v1576_v48 = vor.u32 %v2082_v40, %v1573_v41  ;;  %v2080_v49 = vld [vmem:[#allocation2 + $0x134] sm:$0xf0]  ;;  %v2046_v50 = vld [vmem:[#allocation2 + $0x2c] sm:$0xf]  ;;  %v1429_v52 = vld [vmem:[#allocation2 + $0x38] sm:$0xf0]  ;;  %v1428_v56 = vor.u32 %v2048_v46, %v1427_v45 }
  0x2e   :  { %650 = vmatpush.bf16.msrb.mxu2 %v1512_v60  ;;  %v2078_v53 = vld [vmem:[#allocation2 + $0x12c] sm:$0xf]  ;;  %v1557_v54 = vld [vmem:[#allocation2 + $0x138] sm:$0xf0]  ;;  %v1411_v57 = vld [vmem:[#allocation2 + $0x8] sm:$0xf]  ;;  %v1556_v58 = vor.u32 %v2080_v49, %v1555_v47  ;;  %v1432_v59 = vor.u32 %v2046_v50, %v1429_v52 }
  0x2f   :  { %664 = vmatpush.bf16.msrb.mxu3 %v1640_v0  ;;  %v2044_v60 = vld [vmem:[#allocation2 + $0x14] sm:$0xf0]  ;;  %v1539_v61 = vld [vmem:[#allocation2 + $0x108] sm:$0xf]  ;;  %v1560_v63 = vor.u32 %v2078_v53, %v1557_v54  ;;  %v2042_v0 = vld [vmem:[#allocation2 + $0xc] sm:$0xf] }
  0x30   :  { %623 = vmatpush.bf16.msrb.mxu0 %v1492_v6  ;;  %v2076_v62 = vld [vmem:[#allocation2 + $0x114] sm:$0xf0]  ;;  %v1413_v1 = vld [vmem:[#allocation2 + $0x18] sm:$0xf0]  ;;  %v2074_v2 = vld [vmem:[#allocation2 + $0x10c] sm:$0xf]  ;;  %v1412_v6 = vor.u32 %v2044_v60, %v1411_v57 }
  0x31   :  { %637 = vmatpush.bf16.msrb.mxu1 %v1620_v7  ;;  %v1541_v3 = vld [vmem:[#allocation2 + $0x118] sm:$0xf0]  ;;  %v1715_v4 = vld [vmem:[#allocation2 + $0x2e0] sm:$0xf]  ;;  %v2120_v5 = vld [vmem:[#allocation2 + $0x2ec] sm:$0xf0]  ;;  %v1540_v9 = vor.u32 %v2076_v62, %v1539_v61  ;;  %v1416_v10 = vor.u32 %v2042_v0, %v1413_v1 }
  0x32   :  { %651 = vmatpush.bf16.msrb.mxu2 %v1496_v8  ;;  %v1779_v7 = vld [vmem:[#allocation2 + $0x3e0] sm:$0xf]  ;;  %v2136_v8 = vld [vmem:[#allocation2 + $0x3ec] sm:$0xf0]  ;;  %v1544_v11 = vor.u32 %v2074_v2, %v1541_v3  ;;  %v2119_v50 = vld [vmem:[#allocation2 + $0x2e4] sm:$0xf] }
  0x33   :  { %665 = vmatpush.bf16.msrb.mxu3 %v1624_v12  ;;  %v1716_v12 = vor.u32 %v2120_v5, %v1715_v4  ;;  %v1707_v13 = vld [vmem:[#allocation2 + $0x2c0] sm:$0xf]  ;;  %v2118_v14 = vld [vmem:[#allocation2 + $0x2cc] sm:$0xf0]  ;;  %v1780_v15 = vor.u32 %v2136_v8, %v1779_v7  ;;  %v1717_v53 = vld [vmem:[#allocation2 + $0x2f0] sm:$0xf0] }
  0x34   :  { %624 = vmatpush.bf16.msrb.mxu0 %v1476_v18  ;;  %v1771_v16 = vld [vmem:[#allocation2 + $0x3c0] sm:$0xf]  ;;  %v2134_v17 = vld [vmem:[#allocation2 + $0x3cc] sm:$0xf0]  ;;  %v1708_v18 = vor.u32 %v2118_v14, %v1707_v13  ;;  %v1720_v57 = vor.u32 %v2119_v50, %v1717_v53  ;;  %v2117_v61 = vld [vmem:[#allocation2 + $0x2c4] sm:$0xf] }
  0x35   :  { %638 = vmatpush.bf16.msrb.mxu1 %v1604_v19  ;;  %v1699_v19 = vld [vmem:[#allocation2 + $0x2a0] sm:$0xf]  ;;  %v1772_v21 = vor.u32 %v2134_v17, %v1771_v16  ;;  %v2132_v23 = vld [vmem:[#allocation2 + $0x3ac] sm:$0xf0]  ;;  %v2135_v7 = vld [vmem:[#allocation2 + $0x3e4] sm:$0xf] }
  0x36   :  { %652 = vmatpush.bf16.msrb.mxu2 %v1480_v20  ;;  %v2116_v20 = vld [vmem:[#allocation2 + $0x2ac] sm:$0xf0]  ;;  %v1763_v22 = vld [vmem:[#allocation2 + $0x3a0] sm:$0xf]  ;;  %v1781_v8 = vld [vmem:[#allocation2 + $0x3f0] sm:$0xf0] }
  0x37   :  { %666 = vmatpush.bf16.msrb.mxu3 %v1608_v24  ;;  %v1700_v24 = vor.u32 %v2116_v20, %v1699_v19  ;;  %v1691_v25 = vld [vmem:[#allocation2 + $0x280] sm:$0xf]  ;;  %v2114_v26 = vld [vmem:[#allocation2 + $0x28c] sm:$0xf0]  ;;  %v1764_v27 = vor.u32 %v2132_v23, %v1763_v22  ;;  %v1701_v14 = vld [vmem:[#allocation2 + $0x2b0] sm:$0xf0] }
  0x38   :  { %625 = vmatpush.bf16.msrb.mxu0 %v1460_v30  ;;  %v1755_v28 = vld [vmem:[#allocation2 + $0x380] sm:$0xf]  ;;  %v2130_v29 = vld [vmem:[#allocation2 + $0x38c] sm:$0xf0]  ;;  %v1692_v30 = vor.u32 %v2114_v26, %v1691_v25  ;;  %v1773_v20 = vld [vmem:[#allocation2 + $0x3d0] sm:$0xf0] }
  0x39   :  { %639 = vmatpush.bf16.msrb.mxu1 %v1588_v31  ;;  %v1683_v31 = vld [vmem:[#allocation2 + $0x260] sm:$0xf]  ;;  %v1756_v33 = vor.u32 %v2130_v29, %v1755_v28  ;;  %v2126_v39 = vld [vmem:[#allocation2 + $0x34c] sm:$0xf0]  ;;  %v1693_v26 = vld [vmem:[#allocation2 + $0x290] sm:$0xf0] }
  0x3a   :  { %653 = vmatpush.bf16.msrb.mxu2 %v1464_v32  ;;  %v2112_v32 = vld [vmem:[#allocation2 + $0x26c] sm:$0xf0]  ;;  %v1747_v34 = vld [vmem:[#allocation2 + $0x360] sm:$0xf] }
  0x3b   :  { %667 = vmatpush.bf16.msrb.mxu3 %v1592_v36  ;;  %v1684_v35 = vor.u32 %v2112_v32, %v1683_v31  ;;  %v2110_v36 = vld [vmem:[#allocation2 + $0x24c] sm:$0xf0]  ;;  %v1739_v38 = vld [vmem:[#allocation2 + $0x340] sm:$0xf]  ;;  %v1765_v32 = vld [vmem:[#allocation2 + $0x3b0] sm:$0xf0] }
  0x3c   :  { %626 = vmatpush.bf16.msrb.mxu0 %v1444_v42  ;;  %v1667_v41 = vld [vmem:[#allocation2 + $0x220] sm:$0xf]  ;;  %v2108_v42 = vld [vmem:[#allocation2 + $0x22c] sm:$0xf0] }
  0x3d   :  { %640 = vmatpush.bf16.msrb.mxu1 %v1572_v43  ;;  %v1740_v43 = vor.u32 %v2126_v39, %v1739_v38  ;;  %v1659_v45 = vld [vmem:[#allocation2 + $0x200] sm:$0xf]  ;;  %v2106_v46 = vld [vmem:[#allocation2 + $0x20c] sm:$0xf0] }
  0x3e   :  { %654 = vmatpush.bf16.msrb.mxu2 %v1448_v44  ;;  %v1668_v44 = vor.u32 %v2108_v42, %v1667_v41  ;;  %v1660_v47 = vor.u32 %v2106_v46, %v1659_v45  ;;  %v2152_v49 = vld [vmem:[#allocation2 + $0x4ec] sm:$0xf0]  ;;  %v1731_v54 = vld [vmem:[#allocation2 + $0x320] sm:$0xf]  ;;  %v1757_v42 = vld [vmem:[#allocation2 + $0x390] sm:$0xf0] }
  0x3f   :  { %668 = vmatpush.bf16.msrb.mxu3 %v1576_v48  ;;  %v1843_v48 = vld [vmem:[#allocation2 + $0x4e0] sm:$0xf]  ;;  %v2150_v60 = vld [vmem:[#allocation2 + $0x4cc] sm:$0xf0]  ;;  %v2109_v46 = vld [vmem:[#allocation2 + $0x244] sm:$0xf] }
  0x40   :  { %627 = vmatpush.bf16.msrb.mxu0 %v1428_v56  ;;  %v1844_v52 = vor.u32 %v2152_v49, %v1843_v48  ;;  %v2124_v56 = vld [vmem:[#allocation2 + $0x32c] sm:$0xf0]  ;;  %v1723_v0 = vld [vmem:[#allocation2 + $0x300] sm:$0xf]  ;;  %v1677_v49 = vld [vmem:[#allocation2 + $0x250] sm:$0xf0] }
  0x41   :  { %641 = vmatpush.bf16.msrb.mxu1 %v1556_v58  ;;  %v1732_v58 = vor.u32 %v2124_v56, %v1731_v54  ;;  %v2122_v1 = vld [vmem:[#allocation2 + $0x30c] sm:$0xf0]  ;;  %v1907_v4 = vld [vmem:[#allocation2 + $0x5e0] sm:$0xf]  ;;  %v1680_v50 = vor.u32 %v2109_v46, %v1677_v49  ;;  %v2127_v54 = vld [vmem:[#allocation2 + $0x364] sm:$0xf] }
  0x42   :  { %655 = vmatpush.bf16.msrb.mxu2 %v1432_v59  ;;  %v1835_v59 = vld [vmem:[#allocation2 + $0x4c0] sm:$0xf]  ;;  %v1724_v3 = vor.u32 %v2122_v1, %v1723_v0  ;;  %v2168_v5 = vld [vmem:[#allocation2 + $0x5ec] sm:$0xf0]  ;;  %v2165_v46 = vld [vmem:[#allocation2 + $0x5c4] sm:$0xf] }
  0x43   :  { %669 = vmatpush.bf16.msrb.mxu3 %v1560_v63  ;;  %v1836_v62 = vor.u32 %v2150_v60, %v1835_v59  ;;  %v1709_v63 = vld [vmem:[#allocation2 + $0x2d0] sm:$0xf0]  ;;  %v1899_v16 = vld [vmem:[#allocation2 + $0x5c0] sm:$0xf]  ;;  %v2166_v17 = vld [vmem:[#allocation2 + $0x5cc] sm:$0xf0] }
  0x44   :  { %628 = vmatpush.bf16.msrb.mxu0 %v1412_v6  ;;  %v1712_v2 = vor.u32 %v2117_v61, %v1709_v63  ;;  %v1908_v6 = vor.u32 %v2168_v5, %v1907_v4  ;;  %v1900_v19 = vor.u32 %v2166_v17, %v1899_v16  ;;  %v1819_v22 = vld [vmem:[#allocation2 + $0x480] sm:$0xf]  ;;  %v2146_v23 = vld [vmem:[#allocation2 + $0x48c] sm:$0xf0]  ;;  %v1669_v63 = vld [vmem:[#allocation2 + $0x230] sm:$0xf0] }
  0x45   :  { %642 = vmatpush.bf16.msrb.mxu1 %v1540_v9  ;;  %v1784_v9 = vor.u32 %v2135_v7, %v1781_v8  ;;  %v1820_v25 = vor.u32 %v2146_v23, %v1819_v22  ;;  %v1891_v28 = vld [vmem:[#allocation2 + $0x5a0] sm:$0xf]  ;;  %v2164_v29 = vld [vmem:[#allocation2 + $0x5ac] sm:$0xf0]  ;;  %v2125_v4 = vld [vmem:[#allocation2 + $0x344] sm:$0xf] }
  0x46   :  { %656 = vmatpush.bf16.msrb.mxu2 %v1416_v10  ;;  %v1827_v10 = vld [vmem:[#allocation2 + $0x4a0] sm:$0xf]  ;;  %v1892_v31 = vor.u32 %v2164_v29, %v1891_v28  ;;  %v2162_v39 = vld [vmem:[#allocation2 + $0x58c] sm:$0xf0]  ;;  %v1741_v5 = vld [vmem:[#allocation2 + $0x350] sm:$0xf0] }
  0x47   :  { %670 = vmatpush.bf16.msrb.mxu3 %v1544_v11  ;;  %629 = vmatmul.bf16.vlgmr.msrb.gmra.mxu0 %v2265_v51  ;;  %v2148_v11 = vld [vmem:[#allocation2 + $0x4ac] sm:$0xf0]  ;;  %v1883_v38 = vld [vmem:[#allocation2 + $0x580] sm:$0xf]  ;;  %v1744_v7 = vor.u32 %v2125_v4, %v1741_v5  ;;  %v1845_v16 = vld [vmem:[#allocation2 + $0x4f0] sm:$0xf0] }
  0x48   :  { %1011 = vmatpush.bf16.msra.mxu0 %v1716_v12  ;;  %643 = vmatmul.bf16.vlgmr.msrb.gmra.mxu1 %v2267_v55  ;;  %v2115_v12 = vld [vmem:[#allocation2 + $0x2a4] sm:$0xf]  ;;  %v1828_v13 = vor.u32 %v2148_v11, %v1827_v10  ;;  %v1884_v41 = vor.u32 %v2162_v39, %v1883_v38  ;;  %v2142_v45 = vld [vmem:[#allocation2 + $0x44c] sm:$0xf0]  ;;  %v1867_v0 = vld [vmem:[#allocation2 + $0x540] sm:$0xf] }
  0x49   :  { %1025 = vmatpush.bf16.msra.mxu1 %v1780_v15  ;;  %657 = vmatmul.bf16.vlgmr.msrb.gmra.mxu2 %v2265_v51  ;;  %v2128_v51 = vld [vmem:[#allocation2 + $0x36c] sm:$0xf0]  ;;  %v1704_v15 = vor.u32 %v2115_v12, %v1701_v14  ;;  %v1787_v8 = vld [vmem:[#allocation2 + $0x400] sm:$0xf]  ;;  %v2105_v10 = vld [vmem:[#allocation2 + $0x204] sm:$0xf] }
  0x4a   :  { %671 = vmatmul.bf16.vlgmr.msrb.gmra.mxu3 %v2267_v55  ;;  %v1675_v55 = vld [vmem:[#allocation2 + $0x240] sm:$0xf]  ;;  %v1748_v37 = vor.u32 %v2128_v51, %v1747_v34  ;;  %1039 = vmatpush.bf16.msra.mxu2 %v1844_v52  ;;  %v2144_v51 = vld [vmem:[#allocation2 + $0x46c] sm:$0xf0]  ;;  %v2151_v14 = vld [vmem:[#allocation2 + $0x4e4] sm:$0xf] }
  0x4b   :  { %v1676_v40 = vor.u32 %v2110_v36, %v1675_v55  ;;  %1053 = vmatpush.bf16.msra.mxu3 %v1908_v6  ;;  %v1811_v34 = vld [vmem:[#allocation2 + $0x460] sm:$0xf]  ;;  %v1685_v36 = vld [vmem:[#allocation2 + $0x270] sm:$0xf0]  ;;  %v2160_v53 = vld [vmem:[#allocation2 + $0x56c] sm:$0xf0] }
  0x4c   :  { %1012 = vmatpush.bf16.msra.mxu0 %v1708_v18  ;;  %v2133_v18 = vld [vmem:[#allocation2 + $0x3c4] sm:$0xf]  ;;  %v1812_v55 = vor.u32 %v2144_v51, %v1811_v34  ;;  %v1875_v52 = vld [vmem:[#allocation2 + $0x560] sm:$0xf]  ;;  %v2140_v59 = vld [vmem:[#allocation2 + $0x42c] sm:$0xf0] }
  0x4d   :  { %1026 = vmatpush.bf16.msra.mxu1 %v1772_v21  ;;  %v1776_v21 = vor.u32 %v2133_v18, %v1773_v20  ;;  %v1876_v56 = vor.u32 %v2160_v53, %v1875_v52  ;;  %v1859_v17 = vld [vmem:[#allocation2 + $0x520] sm:$0xf]  ;;  %v2156_v18 = vld [vmem:[#allocation2 + $0x52c] sm:$0xf0]  ;;  %v1848_v20 = vor.u32 %v2151_v14, %v1845_v16  ;;  %v2123_v22 = vld [vmem:[#allocation2 + $0x324] sm:$0xf] }
  0x4e   :  { %1040 = vmatpush.bf16.msra.mxu2 %v1836_v62  ;;  %v2107_v62 = vld [vmem:[#allocation2 + $0x224] sm:$0xf]  ;;  %v1733_v23 = vld [vmem:[#allocation2 + $0x330] sm:$0xf0] }
  0x4f   :  { %1054 = vmatpush.bf16.msra.mxu3 %v1900_v19  ;;  %v1837_v28 = vld [vmem:[#allocation2 + $0x4d0] sm:$0xf0]  ;;  %v2147_v39 = vld [vmem:[#allocation2 + $0x4a4] sm:$0xf] }
  0x50   :  { %1013 = vmatpush.bf16.msra.mxu0 %v1700_v24  ;;  %v2113_v24 = vld [vmem:[#allocation2 + $0x284] sm:$0xf]  ;;  %v1725_v51 = vld [vmem:[#allocation2 + $0x310] sm:$0xf0] }
  0x51   :  { %1027 = vmatpush.bf16.msra.mxu1 %v1764_v27  ;;  %v1696_v27 = vor.u32 %v2113_v24, %v1693_v26  ;;  %v2141_v14 = vld [vmem:[#allocation2 + $0x444] sm:$0xf] }
  0x52   :  { %1041 = vmatpush.bf16.msra.mxu2 %v1828_v13  ;;  %v1661_v13 = vld [vmem:[#allocation2 + $0x210] sm:$0xf0] }
  0x53   :  { %1055 = vmatpush.bf16.msra.mxu3 %v1892_v31  ;;  %v1851_v31 = vld [vmem:[#allocation2 + $0x500] sm:$0xf] }
  0x54   :  { %1014 = vmatpush.bf16.msra.mxu0 %v1692_v30  ;;  %v2131_v30 = vld [vmem:[#allocation2 + $0x3a4] sm:$0xf] }
  0x55   :  { %1028 = vmatpush.bf16.msra.mxu1 %v1756_v33  ;;  %v1768_v33 = vor.u32 %v2131_v30, %v1765_v32  ;;  %v2154_v32 = vld [vmem:[#allocation2 + $0x50c] sm:$0xf0] }
  0x56   :  { %1042 = vmatpush.bf16.msra.mxu2 %v1820_v25  ;;  %v1736_v25 = vor.u32 %v2123_v22, %v1733_v23  ;;  %v1852_v34 = vor.u32 %v2154_v32, %v1851_v31  ;;  %v1797_v22 = vld [vmem:[#allocation2 + $0x430] sm:$0xf0]  ;;  %v2157_v23 = vld [vmem:[#allocation2 + $0x544] sm:$0xf] }
  0x57   :  { %1056 = vmatpush.bf16.msra.mxu3 %v1884_v41  ;;  %v2155_v32 = vld [vmem:[#allocation2 + $0x524] sm:$0xf] }
  0x58   :  { %1015 = vmatpush.bf16.msra.mxu0 %v1684_v35  ;;  %v2111_v35 = vld [vmem:[#allocation2 + $0x264] sm:$0xf] }
  0x59   :  { %1029 = vmatpush.bf16.msra.mxu1 %v1748_v37  ;;  %v1688_v37 = vor.u32 %v2111_v35, %v1685_v36  ;;  %v2167_v35 = vld [vmem:[#allocation2 + $0x5e4] sm:$0xf]  ;;  %v1909_v36 = vld [vmem:[#allocation2 + $0x5f0] sm:$0xf0] }
  0x5a   :  { %1043 = vmatpush.bf16.msra.mxu2 %v1812_v55  ;;  %v1912_v38 = vor.u32 %v2167_v35, %v1909_v36 }
  0x5b   :  { %1057 = vmatpush.bf16.msra.mxu3 %v1876_v56  ;;  %v1821_v56 = vld [vmem:[#allocation2 + $0x490] sm:$0xf0] }
  0x5c   :  { %1016 = vmatpush.bf16.msra.mxu0 %v1676_v40  ;;  %v2129_v40 = vld [vmem:[#allocation2 + $0x384] sm:$0xf] }
  0x5d   :  { %1030 = vmatpush.bf16.msra.mxu1 %v1740_v43  ;;  %v1760_v43 = vor.u32 %v2129_v40, %v1757_v42  ;;  %v1829_v40 = vld [vmem:[#allocation2 + $0x4b0] sm:$0xf0] }
  0x60   :  { %1017 = vmatpush.bf16.msra.mxu0 %v1668_v44  ;;  %v1803_v44 = vld [vmem:[#allocation2 + $0x440] sm:$0xf] }
  0x61   :  { %1031 = vmatpush.bf16.msra.mxu1 %v1732_v58  ;;  %v1804_v48 = vor.u32 %v2142_v45, %v1803_v44  ;;  %v1795_v58 = vld [vmem:[#allocation2 + $0x420] sm:$0xf] }
  0x62   :  { %v1796_v61 = vor.u32 %v2140_v59, %v1795_v58 }
  0x63   :  { %1044 = vmatpush.bf16.msra.mxu2 %v1804_v48  ;;  %v1901_v48 = vld [vmem:[#allocation2 + $0x5d0] sm:$0xf0] }
  0x64   :  { %1018 = vmatpush.bf16.msra.mxu0 %v1660_v47  ;;  %v2277_v47 = vld [vmem:[#allocation2 + $0x600] sm:$0x11]  ;;  %v1904_v52 = vor.u32 %v2165_v46, %v1901_v48 }
  0x65   :  { %1032 = vmatpush.bf16.msra.mxu1 %v1724_v3  ;;  %v221_v1 = vunpack.c.l.bf16 %v2277_v47  ;;  %v2158_v3 = vld [vmem:[#allocation2 + $0x54c] sm:$0xf0]  ;;  %v222_v26 = vunpack.c.h.bf16 %v2277_v47  ;;  %v2007_v47 = vld [vmem:[#allocation2 + $0x4e8] sm:$0xf] }
  0x66   :  { %v1868_v6 = vor.u32 %v2158_v3, %v1867_v0  ;;  %v1813_v3 = vld [vmem:[#allocation2 + $0x470] sm:$0xf0] }
  0x67   :  { %1045 = vmatpush.bf16.msra.mxu2 %v1796_v61  ;;  %v231_v11 = vperm.slane %v221_v1, 0  ;;  %v1893_v61 = vld [vmem:[#allocation2 + $0x5b0] sm:$0xf0] }
  0x68   :  { %1067 = vmatpush.bf16.msrb.mxu0 %v1720_v57  ;;  %v1749_v57 = vld [vmem:[#allocation2 + $0x370] sm:$0xf0]  ;;  %1058 = vmatpush.bf16.msra.mxu3 %v1868_v6 }
  0x69   :  { %1081 = vmatpush.bf16.msrb.mxu1 %v1784_v9  ;;  %v1752_v60 = vor.u32 %v2127_v54, %v1749_v57  ;;  %v2138_v9 = vld [vmem:[#allocation2 + $0x40c] sm:$0xf0]  ;;  %v2145_v54 = vld [vmem:[#allocation2 + $0x484] sm:$0xf] }
  0x6a   :  { %v1788_v12 = vor.u32 %v2138_v9, %v1787_v8  ;;  %v1824_v59 = vor.u32 %v2145_v54, %v1821_v56  ;;  %v2161_v9 = vld [vmem:[#allocation2 + $0x584] sm:$0xf] }
  0x6c   :  { %1068 = vmatpush.bf16.msrb.mxu0 %v1712_v2  ;;  %v1672_v2 = vor.u32 %v2107_v62, %v1669_v63  ;;  %1046 = vmatpush.bf16.msra.mxu2 %v1788_v12 }
  0x6d   :  { %1082 = vmatpush.bf16.msrb.mxu1 %v1776_v21  ;;  %v1860_v21 = vor.u32 %v2156_v18, %v1859_v17  ;;  %v2159_v18 = vld [vmem:[#allocation2 + $0x564] sm:$0xf] }
  0x6f   :  { %1059 = vmatpush.bf16.msra.mxu3 %v1860_v21  ;;  %v2139_v21 = vld [vmem:[#allocation2 + $0x424] sm:$0xf] }
  0x70   :  { %1069 = vmatpush.bf16.msrb.mxu0 %v1704_v15  ;;  %v1664_v15 = vor.u32 %v2105_v10, %v1661_v13  ;;  %1095 = vmatpush.bf16.msrb.mxu2 %v1848_v20  ;;  %v1885_v10 = vld [vmem:[#allocation2 + $0x590] sm:$0xf0] }
  0x71   :  { %1083 = vmatpush.bf16.msrb.mxu1 %v1768_v33  ;;  %v2121_v33 = vld [vmem:[#allocation2 + $0x304] sm:$0xf] }
  0x72   :  { %v1728_v55 = vor.u32 %v2121_v33, %v1725_v51  ;;  %v1861_v33 = vld [vmem:[#allocation2 + $0x530] sm:$0xf0] }
  0x73   :  { %1060 = vmatpush.bf16.msra.mxu3 %v1852_v34  ;;  %v1864_v35 = vor.u32 %v2155_v32, %v1861_v33  ;;  %v2182_v32 = vld [vmem:[#allocation2 + $0x3b4] sm:$0xf0] }
  0x74   :  { %1070 = vmatpush.bf16.msrb.mxu0 %v1696_v27  ;;  %v2149_v27 = vld [vmem:[#allocation2 + $0x4c4] sm:$0xf] }
  0x75   :  { %1084 = vmatpush.bf16.msrb.mxu1 %v1760_v43  ;;  %v1840_v30 = vor.u32 %v2149_v27, %v1837_v28  ;;  %v1832_v43 = vor.u32 %v2147_v39, %v1829_v40  ;;  %v1869_v27 = vld [vmem:[#allocation2 + $0x550] sm:$0xf0]  ;;  %v220_v28 = vld [vmem:[#allocation2 + $0x608] sm:$0x11] }
  0x76   :  { %v1872_v31 = vor.u32 %v2157_v23, %v1869_v27  ;;  %v223_v34 = vunpack.c.l.bf16 %v220_v28  ;;  %v1853_v39 = vld [vmem:[#allocation2 + $0x510] sm:$0xf0]  ;;  %v1971_v23 = vld [vmem:[#allocation2 + $0x3c8] sm:$0xf] }
  0x77   :  { %1096 = vmatpush.bf16.msrb.mxu2 %v1840_v30  ;;  %1109 = vmatpush.bf16.msrb.mxu3 %v1912_v38  ;;  %v1789_v30 = vld [vmem:[#allocation2 + $0x410] sm:$0xf0]  ;;  %v2153_v38 = vld [vmem:[#allocation2 + $0x504] sm:$0xf] }
  0x78   :  { %1071 = vmatpush.bf16.msrb.mxu0 %v1688_v37  ;;  %v232_v37 = vperm.slane %v222_v26, 0  ;;  %v233_v36 = vperm.slane %v223_v34, 0  ;;  %v1856_v40 = vor.u32 %v2153_v38, %v1853_v39  ;;  %v1915_v34 = vld [vmem:[#allocation2 + $0x208] sm:$0xf]  ;;  %v2180_v39 = vld [vmem:[#allocation2 + $0x374] sm:$0xf0] }
  0x79   :  { %1085 = vmatpush.bf16.msrb.mxu1 %v1752_v60  ;;  %v2163_v60 = vld [vmem:[#allocation2 + $0x5a4] sm:$0xf]  ;;  %v1959_v38 = vld [vmem:[#allocation2 + $0x368] sm:$0xf] }
  0x7a   :  { %v1896_v63 = vor.u32 %v2163_v60, %v1893_v61 }
  0x7b   :  { %1097 = vmatpush.bf16.msrb.mxu2 %v1832_v43  ;;  %1110 = vmatpush.bf16.msrb.mxu3 %v1904_v52 }
  0x7c   :  { %1072 = vmatpush.bf16.msrb.mxu0 %v1680_v50 }
  0x7d   :  { %1086 = vmatpush.bf16.msrb.mxu1 %v1744_v7 }
  0x7f   :  { %1098 = vmatpush.bf16.msrb.mxu2 %v1824_v59  ;;  %1111 = vmatpush.bf16.msrb.mxu3 %v1896_v63 }
  0x80   :  { %1073 = vmatpush.bf16.msrb.mxu0 %v1672_v2  ;;  %v2143_v2 = vld [vmem:[#allocation2 + $0x464] sm:$0xf] }
  0x81   :  { %1087 = vmatpush.bf16.msrb.mxu1 %v1736_v25  ;;  %v1816_v6 = vor.u32 %v2143_v2, %v1813_v3  ;;  %v1800_v25 = vor.u32 %v2139_v21, %v1797_v22  ;;  %v1943_v3 = vld [vmem:[#allocation2 + $0x2e8] sm:$0xf]  ;;  %v2171_v22 = vld [vmem:[#allocation2 + $0x254] sm:$0xf0] }
  0x82   :  { %v1923_v21 = vld [vmem:[#allocation2 + $0x248] sm:$0xf] }
  0x83   :  { %1099 = vmatpush.bf16.msrb.mxu2 %v1816_v6  ;;  %v1939_v6 = vld [vmem:[#allocation2 + $0x2c8] sm:$0xf] }
  0x84   :  { %1074 = vmatpush.bf16.msrb.mxu0 %v1664_v15  ;;  %v1805_v15 = vld [vmem:[#allocation2 + $0x450] sm:$0xf0] }
  0x85   :  { %1088 = vmatpush.bf16.msrb.mxu1 %v1728_v55  ;;  %v1808_v16 = vor.u32 %v2141_v14, %v1805_v15  ;;  %v1927_v15 = vld [vmem:[#allocation2 + $0x268] sm:$0xf] }
  0x87   :  { %1100 = vmatpush.bf16.msrb.mxu2 %v1808_v16  ;;  %v2172_v16 = vld [vmem:[#allocation2 + $0x274] sm:$0xf0] }
  0x8b   :  { %1101 = vmatpush.bf16.msrb.mxu2 %v1800_v25  ;;  %v2183_v25 = vld [vmem:[#allocation2 + $0x3d4] sm:$0xf0] }
  0x8c   :  { %v1972_v27 = vor.u32 %v2183_v25, %v1971_v23 }
  0xa4   :  { %v574_v19 = vpop.f32.mrf.mxu0 }
  0xa5   :  { %v588_v24 = vpop.f32.mrf.mxu1  ;;  %v575_v29 = vadd.f32 %v574_v19, %v231_v11  ;;  %v1877_v19 = vld [vmem:[#allocation2 + $0x570] sm:$0xf0] }
  0xa6   :  { %v1880_v20 = vor.u32 %v2159_v18, %v1877_v19  ;;  %v1928_v18 = vor.u32 %v2172_v16, %v1927_v15  ;;  %v2184_v19 = vld [vmem:[#allocation2 + $0x3f4] sm:$0xf0] }
  0xa7   :  { %v589_v41 = vadd.f32 %v588_v24, %v575_v29  ;;  %v2137_v29 = vld [vmem:[#allocation2 + $0x404] sm:$0xf] }
  0xa8   :  { %v1792_v51 = vor.u32 %v2137_v29, %v1789_v30  ;;  %v2170_v29 = vld [vmem:[#allocation2 + $0x234] sm:$0xf0]  ;;  %v1967_v30 = vld [vmem:[#allocation2 + $0x3a8] sm:$0xf] }
  0xa9   :  { %v677_v57 = vmax.f32 %v589_v41, 0.0  ;;  %v224_v41 = vunpack.c.h.bf16 %v220_v28  ;;  %v1919_v28 = vld [vmem:[#allocation2 + $0x228] sm:$0xf]  ;;  %v1968_v33 = vor.u32 %v2182_v32, %v1967_v30  ;;  %v2191_v32 = vld [vmem:[#allocation2 + $0x4d4] sm:$0xf0] }
  0xaa   :  { %1102 = vmatpush.bf16.msrb.mxu2 %v1792_v51  ;;  %v2169_v51 = vld [vmem:[#allocation2 + $0x214] sm:$0xf0] }
  0xac   :  { %v602_v42 = vpop.f32.mrf.mxu2  ;;  %v576_v44 = vpop.f32.mrf.mxu0 }
  0xad   :  { %v616_v45 = vpop.f32.mrf.mxu3  ;;  %v577_v49 = vadd.f32 %v576_v44, %v231_v11  ;;  %v590_v50 = vpop.f32.mrf.mxu1  ;;  %v603_v53 = vadd.f32 %v602_v42, %v232_v37  ;;  %v1888_v11 = vor.u32 %v2161_v9, %v1885_v10  ;;  %v234_v44 = vperm.slane %v224_v41, 0  ;;  %v1935_v9 = vld [vmem:[#allocation2 + $0x2a8] sm:$0xf]  ;;  %v2174_v10 = vld [vmem:[#allocation2 + $0x2b4] sm:$0xf0] }
  0xaf   :  { %v591_v58 = vadd.f32 %v590_v50, %v577_v49  ;;  %v617_v0 = vadd.f32 %v616_v45, %v603_v53  ;;  %1112 = vmatpush.bf16.msrb.mxu3 %v1888_v11  ;;  %v1936_v11 = vor.u32 %v2174_v10, %v1935_v9 }
  0xb1   :  { %v681_v62 = vmax.f32 %v591_v58, 0.0  ;;  %v678_v12 = vmax.f32 %v617_v0, 0.0 }
  0xb3   :  { %v685_v4 = vpack.c.bf16 %v681_v62, %v677_v57  ;;  %1113 = vmatpush.bf16.msrb.mxu3 %v1880_v20 }
  0xb4   :  { %v604_v5 = vpop.f32.mrf.mxu2 }
  0xb5   :  { %v605_v7 = vadd.f32 %v604_v5, %v232_v37  ;;  %v618_v8 = vpop.f32.mrf.mxu3  ;;  %1019 = vmatmul.bf16.vlgmr.msra.gmra.mxu0 %v685_v4 }
  0xb7   :  { %v619_v13 = vadd.f32 %v618_v8, %v605_v7  ;;  %1114 = vmatpush.bf16.msrb.mxu3 %v1872_v31  ;;  %v2175_v7 = vld [vmem:[#allocation2 + $0x2d4] sm:$0xf0]  ;;  %v1920_v31 = vor.u32 %v2170_v29, %v1919_v28 }
  0xb8   :  { %v1940_v8 = vor.u32 %v2175_v7, %v1939_v6 }
  0xb9   :  { %v682_v17 = vmax.f32 %v619_v13, 0.0  ;;  %v2173_v13 = vld [vmem:[#allocation2 + $0x294] sm:$0xf0] }
  0xbb   :  { %v686_v24 = vpack.c.bf16 %v682_v17, %v678_v12  ;;  %1115 = vmatpush.bf16.msrb.mxu3 %v1864_v35  ;;  %v1931_v12 = vld [vmem:[#allocation2 + $0x288] sm:$0xf] }
  0xbc   :  { %v1932_v14 = vor.u32 %v2173_v13, %v1931_v12  ;;  %v1975_v17 = vld [vmem:[#allocation2 + $0x3e8] sm:$0xf] }
  0xbd   :  { %1033 = vmatmul.bf16.vlgmr.msra.gmra.mxu1 %v686_v24  ;;  %v1976_v20 = vor.u32 %v2184_v19, %v1975_v17  ;;  %v1963_v35 = vld [vmem:[#allocation2 + $0x388] sm:$0xf] }
  0xbf   :  { %1116 = vmatpush.bf16.msrb.mxu3 %v1856_v40  ;;  %1240 = vmatpush.bf16.msra.mxu1 %v1976_v20  ;;  %v1960_v40 = vor.u32 %v2180_v39, %v1959_v38  ;;  %v1991_v38 = vld [vmem:[#allocation2 + $0x468] sm:$0xf]  ;;  %v2188_v39 = vld [vmem:[#allocation2 + $0x474] sm:$0xf0] }
  0xc3   :  { %1241 = vmatpush.bf16.msra.mxu1 %v1972_v27 }
  0xc4   :  { %v630_v55 = vpop.f32.mrf.mxu0 }
  0xc5   :  { %v644_v37 = vpop.f32.mrf.mxu1  ;;  %1075 = vmatmul.bf16.vlgmr.msrb.gmra.mxu0 %v685_v4  ;;  %v631_v42 = vadd.f32 %v630_v55, %v233_v36  ;;  %v2176_v4 = vld [vmem:[#allocation2 + $0x2f4] sm:$0xf0]  ;;  %v1916_v55 = vor.u32 %v2169_v51, %v1915_v34  ;;  %v1999_v34 = vld [vmem:[#allocation2 + $0x4a8] sm:$0xf] }
  0xc6   :  { %v1944_v5 = vor.u32 %v2176_v4, %v1943_v3  ;;  %v2190_v51 = vld [vmem:[#allocation2 + $0x4b4] sm:$0xf0] }
  0xc7   :  { %v645_v48 = vadd.f32 %v644_v37, %v631_v42  ;;  %1242 = vmatpush.bf16.msra.mxu1 %v1968_v33  ;;  %v1955_v42 = vld [vmem:[#allocation2 + $0x348] sm:$0xf] }
  0xc8   :  { %1226 = vmatpush.bf16.msra.mxu0 %v1944_v5 }
  0xc9   :  { %v679_v54 = vmax.f32 %v645_v48, 0.0  ;;  %v2178_v48 = vld [vmem:[#allocation2 + $0x334] sm:$0xf0] }
  0xcc   :  { %v658_v43 = vpop.f32.mrf.mxu2  ;;  %v632_v46 = vpop.f32.mrf.mxu0  ;;  %1227 = vmatpush.bf16.msra.mxu0 %v1940_v8 }
  0xcd   :  { %v672_v45 = vpop.f32.mrf.mxu3  ;;  %v633_v49 = vadd.f32 %v632_v46, %v233_v36  ;;  %v646_v50 = vpop.f32.mrf.mxu1  ;;  %1089 = vmatmul.bf16.vlgmr.msrb.gmra.mxu1 %v686_v24  ;;  %v659_v53 = vadd.f32 %v658_v43, %v234_v44  ;;  %v1924_v24 = vor.u32 %v2171_v22, %v1923_v21  ;;  %v2181_v36 = vld [vmem:[#allocation2 + $0x394] sm:$0xf0]  ;;  %v1951_v46 = vld [vmem:[#allocation2 + $0x328] sm:$0xf] }
  0xce   :  { %v1964_v37 = vor.u32 %v2181_v36, %v1963_v35  ;;  %v2179_v43 = vld [vmem:[#allocation2 + $0x354] sm:$0xf0]  ;;  %v2000_v35 = vor.u32 %v2190_v51, %v1999_v34  ;;  %v227_v34 = vld [vmem:[#allocation2 + $0x600] sm:$0x4] }
  0xcf   :  { %v647_v52 = vadd.f32 %v646_v50, %v633_v49  ;;  %v673_v59 = vadd.f32 %v672_v45, %v659_v53  ;;  %v1952_v49 = vor.u32 %v2178_v48, %v1951_v46  ;;  %v2177_v53 = vld [vmem:[#allocation2 + $0x314] sm:$0xf0]  ;;  %v1979_v48 = vld [vmem:[#allocation2 + $0x408] sm:$0xf]  ;;  %v228_v51 = vunpack.c.l.bf16 %v227_v34 }
  0xd0   :  { %1228 = vmatpush.bf16.msra.mxu0 %v1936_v11  ;;  %1243 = vmatpush.bf16.msra.mxu1 %v1964_v37  ;;  %v690_v11 = vperm.slane %v222_v26, 1  ;;  %v2192_v26 = vld [vmem:[#allocation2 + $0x4f4] sm:$0xf0] }
  0xd1   :  { %v683_v56 = vmax.f32 %v647_v52, 0.0  ;;  %v680_v63 = vmax.f32 %v673_v59, 0.0  ;;  %v1947_v52 = vld [vmem:[#allocation2 + $0x308] sm:$0xf]  ;;  %v2008_v30 = vor.u32 %v2192_v26, %v2007_v47  ;;  %v2189_v36 = vld [vmem:[#allocation2 + $0x494] sm:$0xf0] }
  0xd3   :  { %v687_v57 = vpack.c.bf16 %v683_v56, %v679_v54  ;;  %v689_v54 = vperm.slane %v221_v1, 1  ;;  %v1948_v56 = vor.u32 %v2177_v53, %v1947_v52  ;;  %v2039_v52 = vld [vmem:[#allocation2 + $0x5e8] sm:$0xf]  ;;  %v2200_v53 = vld [vmem:[#allocation2 + $0x5f4] sm:$0xf0] }
  0xd4   :  { %v660_v58 = vpop.f32.mrf.mxu2  ;;  %1229 = vmatpush.bf16.msra.mxu0 %v1932_v14  ;;  %1244 = vmatpush.bf16.msra.mxu1 %v1960_v40  ;;  %v1992_v40 = vor.u32 %v2188_v39, %v1991_v38 }
  0xd5   :  { %v661_v60 = vadd.f32 %v660_v58, %v234_v44  ;;  %v674_v61 = vpop.f32.mrf.mxu3  ;;  %1047 = vmatmul.bf16.vlgmr.msra.gmra.mxu2 %v687_v57  ;;  %v1956_v44 = vor.u32 %v2179_v43, %v1955_v42  ;;  %v2187_v42 = vld [vmem:[#allocation2 + $0x454] sm:$0xf0] }
  0xd6   :  { %1306 = vmatpush.bf16.msra.mxu2 %v2008_v30 }
  0xd7   :  { %v675_v62 = vadd.f32 %v674_v61, %v661_v60 }
  0xd8   :  { %1230 = vmatpush.bf16.msra.mxu0 %v1928_v18  ;;  %1245 = vmatpush.bf16.msra.mxu1 %v1956_v44  ;;  %v1983_v44 = vld [vmem:[#allocation2 + $0x428] sm:$0xf] }
  0xd9   :  { %v684_v0 = vmax.f32 %v675_v62, 0.0 }
  0xdb   :  { %v688_v2 = vpack.c.bf16 %v684_v0, %v680_v63 }
  0xdc   :  { %1231 = vmatpush.bf16.msra.mxu0 %v1924_v24  ;;  %1246 = vmatpush.bf16.msra.mxu1 %v1952_v49  ;;  %v2185_v49 = vld [vmem:[#allocation2 + $0x414] sm:$0xf0] }
  0xdd   :  { %1061 = vmatmul.bf16.vlgmr.msra.gmra.mxu3 %v688_v2 }
  0xe0   :  { %1232 = vmatpush.bf16.msra.mxu0 %v1920_v31  ;;  %1247 = vmatpush.bf16.msra.mxu1 %v1948_v56  ;;  %v2003_v31 = vld [vmem:[#allocation2 + $0x4c8] sm:$0xf]  ;;  %v2040_v56 = vor.u32 %v2200_v53, %v2039_v52 }
  0xe1   :  { %v2004_v33 = vor.u32 %v2191_v32, %v2003_v31 }
  0xe2   :  { %1372 = vmatpush.bf16.msra.mxu3 %v2040_v56 }
  0xe3   :  { %1307 = vmatpush.bf16.msra.mxu2 %v2004_v33 }
  0xe4   :  { %1233 = vmatpush.bf16.msra.mxu0 %v1916_v55  ;;  %v1995_v55 = vld [vmem:[#allocation2 + $0x488] sm:$0xf] }
  0xe5   :  { %1103 = vmatmul.bf16.vlgmr.msrb.gmra.mxu2 %v687_v57  ;;  %v1996_v37 = vor.u32 %v2189_v36, %v1995_v55 }
  0xe7   :  { %1308 = vmatpush.bf16.msra.mxu2 %v2000_v35  ;;  %v1323_v35 = vperm.slane %v228_v51, 4 }
  0xeb   :  { %1309 = vmatpush.bf16.msra.mxu2 %v1996_v37 }
  0xed   :  { %1117 = vmatmul.bf16.vlgmr.msrb.gmra.mxu3 %v688_v2 }
  0xef   :  { %1310 = vmatpush.bf16.msra.mxu2 %v1992_v40 }
 0x132   :  { %v1020_v41 = vpop.f32.mrf.mxu0 }
 0x133   :  { %v1021_v59 = vadd.f32 %v1020_v41, %v689_v54  ;;  %v1987_v41 = vld [vmem:[#allocation2 + $0x448] sm:$0xf] }
 0x134   :  { %v1988_v43 = vor.u32 %v2187_v42, %v1987_v41 }
 0x136   :  { %1311 = vmatpush.bf16.msra.mxu2 %v1988_v43 }
 0x13a   :  { %v1034_v45 = vpop.f32.mrf.mxu1  ;;  %v1022_v57 = vpop.f32.mrf.mxu0 }
 0x13b   :  { %v1035_v62 = vadd.f32 %v1034_v45, %v1021_v59  ;;  %v1023_v63 = vadd.f32 %v1022_v57, %v689_v54  ;;  %v2186_v45 = vld [vmem:[#allocation2 + $0x434] sm:$0xf0]  ;;  %v2035_v54 = vld [vmem:[#allocation2 + $0x5c8] sm:$0xf] }
 0x13c   :  { %v1984_v46 = vor.u32 %v2186_v45, %v1983_v44  ;;  %v2199_v57 = vld [vmem:[#allocation2 + $0x5d4] sm:$0xf0]  ;;  %v2031_v59 = vld [vmem:[#allocation2 + $0x5a8] sm:$0xf] }
 0x13e   :  { %1312 = vmatpush.bf16.msra.mxu2 %v1984_v46 }
 0x142   :  { %v1036_v58 = vpop.f32.mrf.mxu1  ;;  %v1076_v3 = vpop.f32.mrf.mxu0 }
 0x143   :  { %v1037_v0 = vadd.f32 %v1036_v58, %v1023_v63  ;;  %v1077_v15 = vadd.f32 %v1076_v3, %v690_v11  ;;  %v2036_v58 = vor.u32 %v2199_v57, %v2035_v54  ;;  %v2197_v63 = vld [vmem:[#allocation2 + $0x594] sm:$0xf0] }
 0x145   :  { %1373 = vmatpush.bf16.msra.mxu3 %v2036_v58 }
 0x14a   :  { %v1090_v6 = vpop.f32.mrf.mxu1  ;;  %v1078_v13 = vpop.f32.mrf.mxu0 }
 0x14b   :  { %v1091_v17 = vadd.f32 %v1090_v6, %v1077_v15  ;;  %v1079_v18 = vadd.f32 %v1078_v13, %v690_v11  ;;  %v2023_v15 = vld [vmem:[#allocation2 + $0x568] sm:$0xf] }
 0x152   :  { %v1092_v16 = vpop.f32.mrf.mxu1 }
 0x153   :  { %v1093_v20 = vadd.f32 %v1092_v16, %v1079_v18  ;;  %v2196_v16 = vld [vmem:[#allocation2 + $0x574] sm:$0xf0]  ;;  %v2019_v18 = vld [vmem:[#allocation2 + $0x548] sm:$0xf] }
 0x158   :  { %v1048_v50 = vpop.f32.mrf.mxu2 }
 0x159   :  { %v1049_v2 = vadd.f32 %v1048_v50, %v1035_v62  ;;  %v1980_v50 = vor.u32 %v2185_v49, %v1979_v48  ;;  %v2027_v62 = vld [vmem:[#allocation2 + $0x588] sm:$0xf] }
 0x15a   :  { %v2028_v3 = vor.u32 %v2197_v63, %v2027_v62 }
 0x15b   :  { %1313 = vmatpush.bf16.msra.mxu2 %v1980_v50 }
 0x160   :  { %v1062_v60 = vpop.f32.mrf.mxu3  ;;  %v1050_v61 = vpop.f32.mrf.mxu2 }
 0x161   :  { %v1063_v4 = vadd.f32 %v1062_v60, %v1049_v2  ;;  %v1051_v5 = vadd.f32 %v1050_v61, %v1037_v0  ;;  %v2198_v60 = vld [vmem:[#allocation2 + $0x5b4] sm:$0xf0]  ;;  %v225_v0 = vld [vmem:[#allocation2 + $0x600] sm:$0x2] }
 0x162   :  { %v2032_v61 = vor.u32 %v2198_v60, %v2031_v59 }
 0x163   :  { %v1123_v10 = vmax.f32 %v1063_v4, 0.0  ;;  %v226_v4 = vunpack.c.l.bf16 %v225_v0 }
 0x164   :  { %1374 = vmatpush.bf16.msra.mxu3 %v2032_v61 }
 0x165   :  { %v1129_v6 = vperm.slane %v226_v4, 2 }
 0x168   :  { %v1064_v7 = vpop.f32.mrf.mxu3  ;;  %v1104_v9 = vpop.f32.mrf.mxu2  ;;  %1375 = vmatpush.bf16.msra.mxu3 %v2028_v3 }
 0x169   :  { %v1065_v8 = vadd.f32 %v1064_v7, %v1051_v5  ;;  %v1105_v21 = vadd.f32 %v1104_v9, %v1091_v17  ;;  %v2024_v17 = vor.u32 %v2196_v16, %v2023_v15 }
 0x16b   :  { %v1125_v1 = vmax.f32 %v1065_v8, 0.0 }
 0x16c   :  { %1376 = vmatpush.bf16.msra.mxu3 %v2024_v17 }
 0x16d   :  { %v1127_v12 = vpack.c.bf16 %v1125_v1, %v1123_v10 }
 0x16f   :  { %1234 = vmatmul.bf16.vlgmr.msra.gmra.mxu0 %v1127_v12 }
 0x170   :  { %v1118_v14 = vpop.f32.mrf.mxu3  ;;  %v1106_v19 = vpop.f32.mrf.mxu2 }
 0x171   :  { %v1119_v22 = vadd.f32 %v1118_v14, %v1105_v21  ;;  %v1107_v23 = vadd.f32 %v1106_v19, %v1093_v20  ;;  %v2195_v19 = vld [vmem:[#allocation2 + $0x554] sm:$0xf0]  ;;  %v2015_v21 = vld [vmem:[#allocation2 + $0x528] sm:$0xf] }
 0x172   :  { %v2020_v20 = vor.u32 %v2195_v19, %v2019_v18 }
 0x173   :  { %v1124_v27 = vmax.f32 %v1119_v22, 0.0  ;;  %v2194_v22 = vld [vmem:[#allocation2 + $0x534] sm:$0xf0] }
 0x174   :  { %1377 = vmatpush.bf16.msra.mxu3 %v2020_v20 }
 0x178   :  { %v1120_v24 = vpop.f32.mrf.mxu3 }
 0x179   :  { %v1121_v25 = vadd.f32 %v1120_v24, %v1107_v23  ;;  %v2016_v23 = vor.u32 %v2194_v22, %v2015_v21  ;;  %v2011_v24 = vld [vmem:[#allocation2 + $0x508] sm:$0xf] }
 0x17b   :  { %v1126_v28 = vmax.f32 %v1121_v25, 0.0  ;;  %1378 = vmatpush.bf16.msra.mxu3 %v2016_v23  ;;  %v2193_v25 = vld [vmem:[#allocation2 + $0x514] sm:$0xf0] }
 0x17d   :  { %v1128_v29 = vpack.c.bf16 %v1126_v28, %v1124_v27  ;;  %v2012_v27 = vor.u32 %v2193_v25, %v2011_v24 }
 0x17f   :  { %1248 = vmatmul.bf16.vlgmr.msra.gmra.mxu1 %v1128_v29  ;;  %1379 = vmatpush.bf16.msra.mxu3 %v2012_v27  ;;  %v1257_v29 = vperm.slane %v226_v4, 3 }
 0x1ec   :  { %v1235_v2 = vpop.f32.mrf.mxu0 }
 0x1ed   :  { %v1236_v8 = vadd.f32 %v1235_v2, %v1129_v6 }
 0x1f4   :  { %v1237_v7 = vpop.f32.mrf.mxu0 }
 0x1f5   :  { %v1238_v9 = vadd.f32 %v1237_v7, %v1129_v6 }
 0x1fc   :  { %v1249_v5 = vpop.f32.mrf.mxu1 }
 0x1fd   :  { %v1250_v10 = vadd.f32 %v1249_v5, %v1236_v8 }
 0x1ff   :  { %v1254_v12 = vmax.f32 %v1250_v10, 0.0 }
 0x204   :  { %v1251_v1 = vpop.f32.mrf.mxu1 }
 0x205   :  { %v1252_v11 = vadd.f32 %v1251_v1, %v1238_v9 }
 0x207   :  { %v1255_v13 = vmax.f32 %v1252_v11, 0.0 }
 0x209   :  { %v1256_v14 = vpack.c.bf16 %v1255_v13, %v1254_v12 }
 0x20b   :  { %1314 = vmatmul.bf16.vlgmr.msra.gmra.mxu2 %v1256_v14 }
 0x28e   :  { %v1315_v28 = vpop.f32.mrf.mxu2 }
 0x28f   :  { %v1316_v47 = vadd.f32 %v1315_v28, %v1257_v29 }
 0x291   :  { %v1320_v31 = vmax.f32 %v1316_v47, 0.0 }
 0x296   :  { %v1317_v26 = vpop.f32.mrf.mxu2 }
 0x297   :  { %v1318_v30 = vadd.f32 %v1317_v26, %v1257_v29 }
 0x299   :  { %v1321_v32 = vmax.f32 %v1318_v30, 0.0 }
 0x29b   :  { %v1322_v33 = vpack.c.bf16 %v1321_v32, %v1320_v31 }
 0x29d   :  { %1380 = vmatmul.bf16.vlgmr.msra.gmra.mxu3 %v1322_v33 }
 0x320   :  { %v1381_v55 = vpop.f32.mrf.mxu3 }
 0x321   :  { %v1382_v36 = vadd.f32 %v1381_v55, %v1323_v35 }
 0x323   :  { %1386 = vst [vmem:[%s2297_s2] sm:$0xff] %v1382_v36 }
 0x328   :  { %v1383_v37 = vpop.f32.mrf.mxu3 }
 0x329   :  { %v1384_v38 = vadd.f32 %v1383_v37, %v1323_v35 }
 0x32b   :  { %1387 = vst [vmem:[%s2297_s2 + $0x8] sm:$0xff] %v1384_v38 }
 0x32c   :  { %1392 = vsyncpa [#allocation3], 1 }

</bundles_post_ra>
